<compile_context>
chip_gen: v7x
topology: tpu7x:2x2x1
jax: 0.10.0
libtpu: 0.0.40
codegen_flags: <defaults>
</compile_context>

<pallas_src>
import functools

import jax
import jax.numpy as jnp
from jax.experimental import pallas as pl
from jax.experimental.pallas import tpu as pltpu


def _round_up(x, m):
    return (x + m - 1) // m * m


def _pick_time_chunk(S, skip, t_max=8):
    """Largest T <= t_max with T | S and T | skip (skip==0 imposes nothing)."""
    best = 1
    for d in range(1, min(S, t_max) + 1):
        if S % d == 0 and skip % d == 0:
            best = d
    return best


def ltc_chunk_kernel(wih_ref, params_ref, out_ref, v_ref):
    """LTC recurrence for one (batch b, pixel tile i) over one time chunk.

    grid = (B, pixel_tiles, S // T); the time-chunk axis is "arbitrary".
      wih_ref    : (T, Cout, tc)   conv(x) with bn_scale folded in, for the T
                                   time steps of chunk kc (array order, i.e.
                                   ascending t); io dtype (f32 or bf16)
      params_ref : (5, Cout, 1)    rows = [cm, vleak, tau_m, e_revin, bn_bias]
      out_ref    : (T, Cout, tc)   v_pre written in processing order
      v_ref      : (Cout, tc)      recurrent membrane state (f32 scratch)
    """
    kc = pl.program_id(2)

    @pl.when(kc == 0)
    def _():
        v_ref[...] = jnp.zeros_like(v_ref)

    T = wih_ref.shape[0]
    cout, cols = v_ref.shape

    # Per-channel -> per-lane broadcasts hoisted out of the (unrolled) time
    # loop: done once per chunk of T steps.
    p = params_ref[...]                                      # (5, Cout, 1) f32
    cm      = jnp.broadcast_to(p[0], (cout, cols))
    vleak   = jnp.broadcast_to(p[1], (cout, cols))
    tau_m   = jnp.broadcast_to(p[2], (cout, cols))
    e_revin = jnp.broadcast_to(p[3], (cout, cols))
    bias    = jnp.broadcast_to(p[4], (cout, cols))           # folded BN bias

    # tau_input=True, usetaum=True branch of ConvLTC_v1.forward:
    #   numerator = tau_m * v_pre / (vleak + cm * sigmoid(wih)) + wih * E_revin
    #   v_pre     = sigmoid(numerator / (1 + 1e-8))
    # (1 + 1e-8) == 1.0 exactly in float32, so that divide is dropped.  The
    # leak division is exact (the kernel is HBM-bound; it costs nothing).
    #
    # The PyTorch loop runs t = S-1 .. 0, so inside the chunk (stored in
    # ascending t) we walk rows T-1 .. 0 while writing out rows 0 .. T-1
    # (processing order).
    v = v_ref[...]
    for j in range(T):                                       # static, unrolled
        wih = wih_ref[T - 1 - j].astype(jnp.float32) + bias
        sig = jax.nn.sigmoid(wih)
        v = jax.nn.sigmoid(tau_m * v / (vleak + cm * sig) + wih * e_revin)
        out_ref[j] = v.astype(out_ref.dtype)
    v_ref[...] = v


def conv_ltc_v1_forward(inputs, conv_w, params, *, stream_opt=True,
                        burn_in_time=0, io_dtype=jnp.float32,
                        tile_cols=None, time_chunk_max=8):
    """inputs: (B, C_in, S, H, W) float32 (PyTorch convention).

    conv_w : (C_out, C_in, 3, 3)
    params : (6, C_out) rows = [cm, vleak, tau_m, e_revin, bn_scale, bn_bias]

    Returns (S - burn_in_time, B*C_out, H, W) if stream_opt else (B, C_out, H, W).
    """
    B, Cin, S, H, W = inputs.shape
    Cout = conv_w.shape[0]
    cm, vleak, tau_m, e_revin, bn_scale, bn_bias = (params[i] for i in range(6))

    # ---- stage 1: one 3-D conv (unit kernel over S) for all time steps.
    #  * no input-side transpose: S rides along as a spatial dim of size S
    #  * eval-mode BN scale folded into the weights (bias added in-kernel)
    #  * output spec "NDCHW" == (B, S, Cout, H, W): already the layout the
    #    scan kernel reads, so no wih transpose either.
    w = (conv_w * bn_scale[:, None, None, None]).astype(jnp.float32)
    wih = jax.lax.conv_general_dilated(
        inputs.astype(jnp.float32), w[:, :, None, :, :],
        window_strides=(1, 1, 1),
        padding=((0, 0), (1, 1), (1, 1)),
        dimension_numbers=("NCDHW", "OIDHW", "NDCHW"))        # (B,S,Cout,H,W)
    wih = wih.reshape(B, S, Cout, H * W).astype(io_dtype)

    # ---- time chunking (sequential axis) + burn-in bookkeeping.
    skip = burn_in_time if stream_opt else 0
    assert 0 <= skip < S
    T = _pick_time_chunk(S, skip, time_chunk_max)
    nk = S // T
    skip_chunks = skip // T

    # ---- pixel tiling: Cout on sublanes, flattened H*W pixels on lanes.
    # Tile size auto-picked under a VMEM budget that fits v7x's 64 MiB VMEM:
    # double-buffered in+out blocks + v scratch + ~6 f32 compute temporaries.
    lane = 128
    io_bytes = jnp.dtype(io_dtype).itemsize
    vmem_budget = 40 * 1024 * 1024
    per_col = Cout * (4 * T * io_bytes + 4 + 6 * 4)
    cap = max(lane, (vmem_budget // per_col) // lane * lane)
    tc = min(_round_up(H * W, lane), cap, 32768)
    if tile_cols is not None:
        tc = min(tc, _round_up(tile_cols, lane))
    tc = max(lane, tc // lane * lane)
    hw_pad = _round_up(H * W, tc)
    if hw_pad != H * W:
        # TODO(synk): lane padding costs one extra pass over wih; a masked-tail
        # kernel would avoid it for frame sizes not divisible by 128.
        wih = jnp.pad(wih, ((0, 0), (0, 0), (0, 0), (0, hw_pad - H * W)))

    kparams = jnp.stack([cm, vleak, tau_m, e_revin, bn_bias], 0)
    kparams = kparams.astype(jnp.float32).reshape(5, Cout, 1)

    if stream_opt:
        # PyTorch keeps outputs[burn_in_time:]; the first `skip` steps alias
        # output block 0 and are overwritten before that block is flushed.
        S_out = S - skip
        out_shape = jax.ShapeDtypeStruct((S_out, B, Cout, hw_pad), io_dtype)
        out_index = lambda b, i, kc: (jnp.maximum(kc - skip_chunks, 0), b, 0, i)
    else:
        # Only the final step is needed: keep a single resident output block
        # (constant index) so at most one chunk is ever flushed per tile.
        out_shape = jax.ShapeDtypeStruct((T, B, Cout, hw_pad), io_dtype)
        out_index = lambda b, i, kc: (0, b, 0, i)

    grid = (B, hw_pad // tc, nk)
    out = pl.pallas_call(
        ltc_chunk_kernel,
        out_shape=out_shape,
        grid_spec=pltpu.PrefetchScalarGridSpec(
            num_scalar_prefetch=0,
            grid=grid,
            in_specs=[
                # chunk kc covers t in [S-(kc+1)T, S-kc*T) -> S-block nk-1-kc
                pl.BlockSpec((None, T, Cout, tc),
                             lambda b, i, kc: (b, nk - 1 - kc, 0, i)),
                pl.BlockSpec((5, Cout, 1), lambda b, i, kc: (0, 0, 0)),
            ],
            out_specs=pl.BlockSpec((T, None, Cout, tc), out_index),
            scratch_shapes=[pltpu.VMEM((Cout, tc), jnp.float32)],   # v_pre
        ),
        compiler_params=pltpu.CompilerParams(
            # B and pixel-tile axes are "parallel" (megacore sharding on
            # multi-TC parts); no forced pixel split — on single-TC v5e/v6e it
            # would only double per-grid-step overhead.
            dimension_semantics=("parallel", "parallel", "arbitrary"),
            vmem_limit_bytes=48 * 1024 * 1024),
    )(wih, kparams)

    if stream_opt:
        if hw_pad != H * W:
            out = out[..., :H * W]
        # (S_out, B, Cout, H*W) -> (S_out, B*Cout, H, W): contiguous reshape,
        # matches torch.cat(outputs,0).reshape(S,-1,H,W)[burn_in_time:].
        return out.reshape(S - skip, B * Cout, H, W)
    final = out[T - 1]                                        # last step (t=0)
    if hw_pad != H * W:
        final = final[..., :H * W]
    return final.reshape(B, Cout, H, W)


def reference_forward(inputs, conv_w, params, *, stream_opt=True, burn_in_time=0):
    # Pure-JAX reference mirroring the PyTorch forward (eval-mode BN unfused).
    B, Cin, S, H, W = inputs.shape
    Cout = conv_w.shape[0]
    cm, vleak, tau_m, e_revin, bn_scale, bn_bias = [
        params[i].reshape(1, Cout, 1, 1) for i in range(6)]
    v_pre = jnp.zeros((B, Cout, H, W), jnp.float32)
    outs = []
    for t in range(S - 1, -1, -1):
        xt = inputs[:, :, t]
        wih = jax.lax.conv_general_dilated(
            xt, conv_w, window_strides=(1, 1), padding="SAME",
            dimension_numbers=("NCHW", "OIHW", "NCHW"))
        wih = wih * bn_scale + bn_bias
        numerator = tau_m * v_pre / (vleak + cm * jax.nn.sigmoid(wih)) + wih * e_revin
        v_pre = jax.nn.sigmoid(numerator / (1.0 + 1e-8))
        outs.append(v_pre)
    out = jnp.stack(outs, 0)                                  # (S, B, Cout, H, W)
    if stream_opt:
        return out.reshape(S, B * Cout, H, W)[burn_in_time:]
    return out[-1]


if __name__ == "__main__":
    B, Cin, S, H, W = 2, 4, 8, 16, 16
    Cout = 8               # hparams['nltc']
    burn_in_time = 2
    taum_ini = (5.0, 1.0)

    key = jax.random.PRNGKey(0)
    k_x, k_w, k_cm, k_vl, k_tau, k_er, k_g, k_b = jax.random.split(key, 8)

    inputs = jax.random.normal(k_x, (B, Cin, S, H, W), jnp.float32)

    # xavier_normal_ init for the 3x3 conv weight (deterministic, no checkpoint)
    fan_in, fan_out = Cin * 9, Cout * 9
    std = (2.0 / (fan_in + fan_out)) ** 0.5
    conv_w = std * jax.random.normal(k_w, (Cout, Cin, 3, 3), jnp.float32)

    cm = 1.0 + 0.1 * jax.random.normal(k_cm, (Cout,), jnp.float32)
    vleak = 1.0 + 0.1 * jax.random.normal(k_vl, (Cout,), jnp.float32)
    tau_m = (taum_ini[0] - taum_ini[1]) * jax.random.uniform(
        k_tau, (Cout,), jnp.float32) + taum_ini[1]
    e_revin = 1.0 + 0.1 * jax.random.normal(k_er, (Cout,), jnp.float32)

    # TODO(synk): BatchNorm2d is folded in eval mode (running_mean=0,
    # running_var=1); training-mode batch statistics are not implemented.
    gamma = 1.0 + 0.1 * jax.random.normal(k_g, (Cout,), jnp.float32)
    beta = 0.1 * jax.random.normal(k_b, (Cout,), jnp.float32)
    bn_eps = 1e-5
    bn_scale = gamma / jnp.sqrt(1.0 + bn_eps)
    bn_bias = beta

    params = jnp.stack([cm, vleak, tau_m, e_revin, bn_scale, bn_bias], 0)  # (6, Cout)

    ref_stream = reference_forward(inputs, conv_w, params,
                                   stream_opt=True, burn_in_time=burn_in_time)
    ref_last = reference_forward(inputs, conv_w, params,
                                 stream_opt=False, burn_in_time=burn_in_time)

    # f32 I/O, stream_opt=True (the module's configuration)
    fwd_stream = jax.jit(functools.partial(
        conv_ltc_v1_forward, stream_opt=True, burn_in_time=burn_in_time))
    out = jax.block_until_ready(fwd_stream(inputs, conv_w, params))
    assert out.shape == ref_stream.shape == (S - burn_in_time, B * Cout, H, W), out.shape
    err = float(jnp.max(jnp.abs(out - ref_stream)))
    assert err < 1e-3, f"f32 stream max abs err {err}"

    # f32 I/O, stream_opt=False (single resident output block)
    fwd_last = jax.jit(functools.partial(
        conv_ltc_v1_forward, stream_opt=False, burn_in_time=burn_in_time))
    out_last = jax.block_until_ready(fwd_last(inputs, conv_w, params))
    assert out_last.shape == ref_last.shape == (B, Cout, H, W), out_last.shape
    err_last = float(jnp.max(jnp.abs(out_last - ref_last)))
    assert err_last < 1e-3, f"f32 last-step max abs err {err_last}"

    # bf16 I/O (halved HBM traffic; compute stays f32 in-kernel)
    fwd_bf16 = jax.jit(functools.partial(
        conv_ltc_v1_forward, stream_opt=True, burn_in_time=burn_in_time,
        io_dtype=jnp.bfloat16))
    out_bf16 = jax.block_until_ready(fwd_bf16(inputs, conv_w, params))
    err_bf16 = float(jnp.max(jnp.abs(out_bf16.astype(jnp.float32) - ref_stream)))
    assert err_bf16 < 5e-2, f"bf16 stream max abs err {err_bf16}"

    print("KERNEL_OK")
</pallas_src>

<mosaic_0001>
module attributes {stable_mosaic.version = 11 : i64} {
  func.func @ltc_chunk_kernel(%arg0: i32, %arg1: i32, %arg2: i32, %arg3: memref<1x2x8x256xf32, #tpu.memory_space<vmem>>, %arg4: memref<5x8x1xf32, #tpu.memory_space<vmem>>, %arg5: memref<2x1x8x256xf32, #tpu.memory_space<vmem>>, %arg6: memref<8x256xf32, #tpu.memory_space<vmem>>) attributes {dimension_semantics = [#tpu.dimension_semantics<parallel>, #tpu.dimension_semantics<parallel>, #tpu.dimension_semantics<arbitrary>], iteration_bounds = array<i64: 2, 1, 4>, scalar_prefetch = 0 : i64, scratch_operands = 1 : i64, tpu.core_type = #tpu.core_type<tc>, window_params = [{transform_indices = @transform_0, window_bounds = array<i64: 1, 2, 8, 256>}, {pipeline_mode = #tpu.pipeline_mode<synchronous>, transform_indices = @transform_1, window_bounds = array<i64: 5, 8, 1>}, {transform_indices = @transform_2, window_bounds = array<i64: 2, 1, 8, 256>}]} {
    %c0_i32 = arith.constant 0 : i32
    %0 = arith.cmpi eq, %arg2, %c0_i32 : i32
    %1 = arith.extui %0 : i1 to i32
    %c0_i32_0 = arith.constant 0 : i32
    %2 = arith.cmpi ne, %1, %c0_i32_0 : i32
    scf.if %2 {
      %cst_25 = arith.constant 0.000000e+00 : f32
      %70 = vector.broadcast %cst_25 : f32 to vector<8x256xf32>
      %c0_26 = arith.constant 0 : index
      %c0_27 = arith.constant 0 : index
      %71 = vector.load %arg6[%c0_26, %c0_27] : memref<8x256xf32, #tpu.memory_space<vmem>>, vector<8x256xf32>
      tpu.vector_store %arg6[%c0_26, %c0_27], %70 {strides = array<i32>} : memref<8x256xf32, #tpu.memory_space<vmem>>, vector<8x256xf32>,
    } else {
    }
    %c0 = arith.constant 0 : index
    %c0_1 = arith.constant 0 : index
    %c0_2 = arith.constant 0 : index
    %3 = vector.load %arg4[%c0, %c0_1, %c0_2] : memref<5x8x1xf32, #tpu.memory_space<vmem>>, vector<5x8x1xf32>
    %4 = vector.extract_strided_slice %3 {offsets = [0, 0, 0], sizes = [1, 8, 1], strides = [1, 1, 1]} : vector<5x8x1xf32> to vector<1x8x1xf32>
    %5 = vector.shape_cast %4 : vector<1x8x1xf32> to vector<8x1xf32>
    %6 = vector.shape_cast %5 : vector<8x1xf32> to vector<8x1xf32>
    %7 = vector.broadcast %6 : vector<8x1xf32> to vector<8x256xf32>
    %8 = vector.extract_strided_slice %3 {offsets = [1, 0, 0], sizes = [1, 8, 1], strides = [1, 1, 1]} : vector<5x8x1xf32> to vector<1x8x1xf32>
    %9 = vector.shape_cast %8 : vector<1x8x1xf32> to vector<8x1xf32>
    %10 = vector.shape_cast %9 : vector<8x1xf32> to vector<8x1xf32>
    %11 = vector.broadcast %10 : vector<8x1xf32> to vector<8x256xf32>
    %12 = vector.extract_strided_slice %3 {offsets = [2, 0, 0], sizes = [1, 8, 1], strides = [1, 1, 1]} : vector<5x8x1xf32> to vector<1x8x1xf32>
    %13 = vector.shape_cast %12 : vector<1x8x1xf32> to vector<8x1xf32>
    %14 = vector.shape_cast %13 : vector<8x1xf32> to vector<8x1xf32>
    %15 = vector.broadcast %14 : vector<8x1xf32> to vector<8x256xf32>
    %16 = vector.extract_strided_slice %3 {offsets = [3, 0, 0], sizes = [1, 8, 1], strides = [1, 1, 1]} : vector<5x8x1xf32> to vector<1x8x1xf32>
    %17 = vector.shape_cast %16 : vector<1x8x1xf32> to vector<8x1xf32>
    %18 = vector.shape_cast %17 : vector<8x1xf32> to vector<8x1xf32>
    %19 = vector.broadcast %18 : vector<8x1xf32> to vector<8x256xf32>
    %20 = vector.extract_strided_slice %3 {offsets = [4, 0, 0], sizes = [1, 8, 1], strides = [1, 1, 1]} : vector<5x8x1xf32> to vector<1x8x1xf32>
    %21 = vector.shape_cast %20 : vector<1x8x1xf32> to vector<8x1xf32>
    %22 = vector.shape_cast %21 : vector<8x1xf32> to vector<8x1xf32>
    %23 = vector.broadcast %22 : vector<8x1xf32> to vector<8x256xf32>
    %c0_3 = arith.constant 0 : index
    %c0_4 = arith.constant 0 : index
    %24 = vector.load %arg6[%c0_3, %c0_4] : memref<8x256xf32, #tpu.memory_space<vmem>>, vector<8x256xf32>
    %c0_5 = arith.constant 0 : index
    %c1 = arith.constant 1 : index
    %c0_6 = arith.constant 0 : index
    %c0_7 = arith.constant 0 : index
    %25 = vector.load %arg3[%c0_5, %c1, %c0_6, %c0_7] : memref<1x2x8x256xf32, #tpu.memory_space<vmem>>, vector<1x1x8x256xf32>
    %26 = vector.shape_cast %25 : vector<1x1x8x256xf32> to vector<8x256xf32>
    %27 = arith.addf %26, %23 : vector<8x256xf32>
    %28 = arith.negf %27 : vector<8x256xf32>
    %29 = math.exp %28 : vector<8x256xf32>
    %cst = arith.constant 1.000000e+00 : f32
    %30 = vector.broadcast %cst : f32 to vector<8x256xf32>
    %31 = arith.addf %30, %29 : vector<8x256xf32>
    %32 = arith.divf %30, %31 : vector<8x256xf32>
    %33 = arith.mulf %15, %24 : vector<8x256xf32>
    %34 = arith.mulf %7, %32 : vector<8x256xf32>
    %35 = arith.addf %11, %34 : vector<8x256xf32>
    %36 = arith.divf %33, %35 : vector<8x256xf32>
    %37 = arith.mulf %27, %19 : vector<8x256xf32>
    %38 = arith.addf %36, %37 : vector<8x256xf32>
    %39 = arith.negf %38 : vector<8x256xf32>
    %40 = math.exp %39 : vector<8x256xf32>
    %cst_8 = arith.constant 1.000000e+00 : f32
    %41 = vector.broadcast %cst_8 : f32 to vector<8x256xf32>
    %42 = arith.addf %41, %40 : vector<8x256xf32>
    %43 = arith.divf %41, %42 : vector<8x256xf32>
    %c0_9 = arith.constant 0 : index
    %c0_10 = arith.constant 0 : index
    %c0_11 = arith.constant 0 : index
    %c0_12 = arith.constant 0 : index
    %44 = vector.load %arg5[%c0_9, %c0_10, %c0_11, %c0_12] : memref<2x1x8x256xf32, #tpu.memory_space<vmem>>, vector<1x1x8x256xf32>
    %45 = vector.shape_cast %44 : vector<1x1x8x256xf32> to vector<8x256xf32>
    %46 = vector.shape_cast %43 : vector<8x256xf32> to vector<1x1x8x256xf32>
    tpu.vector_store %arg5[%c0_9, %c0_10, %c0_11, %c0_12], %46 {strides = array<i32>} : memref<2x1x8x256xf32, #tpu.memory_space<vmem>>, vector<1x1x8x256xf32>,
    %c0_13 = arith.constant 0 : index
    %c0_14 = arith.constant 0 : index
    %c0_15 = arith.constant 0 : index
    %c0_16 = arith.constant 0 : index
    %47 = vector.load %arg3[%c0_13, %c0_14, %c0_15, %c0_16] : memref<1x2x8x256xf32, #tpu.memory_space<vmem>>, vector<1x1x8x256xf32>
    %48 = vector.shape_cast %47 : vector<1x1x8x256xf32> to vector<8x256xf32>
    %49 = arith.addf %48, %23 : vector<8x256xf32>
    %50 = arith.negf %49 : vector<8x256xf32>
    %51 = math.exp %50 : vector<8x256xf32>
    %cst_17 = arith.constant 1.000000e+00 : f32
    %52 = vector.broadcast %cst_17 : f32 to vector<8x256xf32>
    %53 = arith.addf %52, %51 : vector<8x256xf32>
    %54 = arith.divf %52, %53 : vector<8x256xf32>
    %55 = arith.mulf %15, %43 : vector<8x256xf32>
    %56 = arith.mulf %7, %54 : vector<8x256xf32>
    %57 = arith.addf %11, %56 : vector<8x256xf32>
    %58 = arith.divf %55, %57 : vector<8x256xf32>
    %59 = arith.mulf %49, %19 : vector<8x256xf32>
    %60 = arith.addf %58, %59 : vector<8x256xf32>
    %61 = arith.negf %60 : vector<8x256xf32>
    %62 = math.exp %61 : vector<8x256xf32>
    %cst_18 = arith.constant 1.000000e+00 : f32
    %63 = vector.broadcast %cst_18 : f32 to vector<8x256xf32>
    %64 = arith.addf %63, %62 : vector<8x256xf32>
    %65 = arith.divf %63, %64 : vector<8x256xf32>
    %c1_19 = arith.constant 1 : index
    %c0_20 = arith.constant 0 : index
    %c0_21 = arith.constant 0 : index
    %c0_22 = arith.constant 0 : index
    %66 = vector.load %arg5[%c1_19, %c0_20, %c0_21, %c0_22] : memref<2x1x8x256xf32, #tpu.memory_space<vmem>>, vector<1x1x8x256xf32>
    %67 = vector.shape_cast %66 : vector<1x1x8x256xf32> to vector<8x256xf32>
    %68 = vector.shape_cast %65 : vector<8x256xf32> to vector<1x1x8x256xf32>
    tpu.vector_store %arg5[%c1_19, %c0_20, %c0_21, %c0_22], %68 {strides = array<i32>} : memref<2x1x8x256xf32, #tpu.memory_space<vmem>>, vector<1x1x8x256xf32>,
    %c0_23 = arith.constant 0 : index
    %c0_24 = arith.constant 0 : index
    %69 = vector.load %arg6[%c0_23, %c0_24] : memref<8x256xf32, #tpu.memory_space<vmem>>, vector<8x256xf32>
    tpu.vector_store %arg6[%c0_23, %c0_24], %65 {strides = array<i32>} : memref<8x256xf32, #tpu.memory_space<vmem>>, vector<8x256xf32>,
    return
  }
  func.func @transform_0(%arg0: i32, %arg1: i32, %arg2: i32) -> (i32, i32, i32, i32) {
    %c3_i32 = arith.constant 3 : i32
    %0 = arith.subi %c3_i32, %arg2 : i32
    %c0_i32 = arith.constant 0 : i32
    %c0_i32_0 = arith.constant 0 : i32
    return %arg0, %0, %c0_i32, %arg1 : i32, i32, i32, i32
  }
  func.func @transform_1(%arg0: i32, %arg1: i32, %arg2: i32) -> (i32, i32, i32) {
    %c0_i32 = arith.constant 0 : i32
    %c0_i32_0 = arith.constant 0 : i32
    %c0_i32_1 = arith.constant 0 : i32
    %c0_i32_2 = arith.constant 0 : i32
    return %c0_i32, %c0_i32_0, %c0_i32_1 : i32, i32, i32
  }
  func.func @transform_2(%arg0: i32, %arg1: i32, %arg2: i32) -> (i32, i32, i32, i32) {
    %c1_i32 = arith.constant 1 : i32
    %0 = arith.subi %arg2, %c1_i32 : i32
    %c0_i32 = arith.constant 0 : i32
    %1 = arith.maxsi %0, %c0_i32 : i32
    %c0_i32_0 = arith.constant 0 : i32
    %c0_i32_1 = arith.constant 0 : i32
    return %1, %arg0, %c0_i32_0, %arg1 : i32, i32, i32, i32
  }
}

</mosaic_0001>

<bundles_post_ra>
// kernel: conv_ltc_v1_forward.1
= control target key start
LH: loop header
LB: loop body
LE: loop exit
PB: predicated region body
PF: predicated region fallthrough
CT: control target
= control target key end

     0   :  { %s674_s9 = smov 0   ;;  %s676_s10 = smov 0   ;;  %s804_s0 = inlined_call_operand.vmem [shape: f32[2,8,8,256], index: 0, kind: input, shape index: {}]   ;;  %s805_s1 = inlined_call_operand.vmem [shape: f32[5,8,1], index: 1, kind: input, shape index: {}]   ;;  %s806_s2 = inlined_call_operand.vmem [shape: f32[6,2,8,256], index: 2, kind: output, shape index: {}]  }
   0x1   :  { %s678_s11 = smov 0   ;;  %s680_s12 = smov 0  }
   0x2   :  { %s682_s13 = smov 0   ;;  %s684_s14 = smov 0  }
   0x3   :  { %s686_s15 = smov 0  }
   0x4 LB: > { %s467_s16 = sadd.s32 4294967295, %s655_s15   ;;  %s24_s17 = sadd.s32 1, %s647_s13  ;;  %s655_s15 = sphi %s686_s15, %s12_s15   ;;  %s651_s14 = sphi %s684_s14, %s813_s14   ;;  %s647_s13 = sphi %s682_s13, %s812_s13   ;;  %s643_s12 = sphi %s680_s12, %s811_s12   ;;  %s639_s11 = sphi %s678_s11, %s810_s11   ;;  %s635_s10 = sphi %s676_s10, %s809_s10   ;;  %s631_s9 = sphi %s674_s9, %s808_s9  }
   0x5   : > { %p25_p0 = scmp.ge.s32.totalorder %s24_s17, 4  ;;  %s31_s18 = sadd.s32 1, %s651_s14 }
   0x6   : > { %s469_s19 = sadd.s32 4294967295, %s647_s13  ;;  %s101_s20 = sadd.s32 1, %s635_s10 }
   0x7   : > { %s815_s17 = smov (%p25_p0, %s24_s17), 0  ;;  %s817_s18 = smov (!%p25_p0, %s31_s18), %s651_s14 }
   0x8   : > { %p89_p1 = scmp.gt.s32.totalorder %s469_s19, 0  ;;  %s470_s21 = sadd.s32 4294967295, %s815_s17 }
   0x9   : > { %p33_p2 = scmp.ge.s32.totalorder %s817_s18, 2  ;;  %p92_p3 = scmp.gt.s32.totalorder %s470_s21, 0 }
   0xa   : > { %s819_s19 = smov (!%p89_p1, %s469_s19), 0  ;;  %p111_p4 = scmp.ne.s32.totalorder %s635_s10, %s631_s9 }
   0xb   : > { %s821_s18 = smov (%p33_p2, %s817_s18), 0  ;;  %s823_s21 = smov (!%p92_p3, %s470_s21), 0 }
   0xc   : > { %s95_s22 = ssub.s32 %s651_s14, %s821_s18  ;;  %s94_s23 = ssub.s32 %s819_s19, %s823_s21 }
   0xd   : > { %p112_p5 = scmp.eq.s32.totalorder %s467_s16, 7  ;;  %s96_s24 = sor.u32 %s95_s22, %s94_s23 }
   0xe   : > { %p473_p6 = scmp.ge.s32.totalorder %s655_s15, 1  ;;  %p99_p7 = scmp.eq.s32.totalorder %s96_s24, 0 }
   0xf   : > { %p725_p8 = por %p112_p5, %p111_p4  ;;  %p160_p9 = scmp.lt.s32.totalorder %s655_s15, 9 }
  0x10   : > { %s731_s26 = scalar_select %p99_p7, %s635_s10, %s101_s20  }
  0x11   : > { %p161_p10 = pnand %p473_p6, %p160_p9 }
  0x12   : > { %s188_s27 = sand.u32 (!%p161_p10), 1, %s631_s9   ;;  %s191_s28 = ssub.s32 (!%p161_p10), 3, %s639_s11 }
  0x13   : > { %164 = sbr.rel (%p161_p10) target bundleno = 279 (0x117), region = 28  ;;  %s474_s29 = sshll.u32 (!%p161_p10), %s188_s27, 5 }
  0x14   : > { %s475_s30 = sshll.u32 (!%p161_p10), %s191_s28, 1  ;;  %p194_p11 = scmp.lt.s32.totalorder (!%p161_p10), %s643_s12, 1 }
  0x15   : > { %p196_p12 = scmp.lt.s32.totalorder (!%p161_p10), %s475_s30, 7  ;;  %s742_s20 = scalar_lea.vmem (!%p161_p10), [#allocation3], %s474_s29 }
  0x16   : > { %p479_p13 = scmp.ne.s32.totalorder (!%p161_p10), %s639_s11, 0 }
  0x1a   : > { %s195_s3 = scalar_select %p194_p11, %s643_s12, 1 }
  0x1b   : > { %s825_s30 = smov (!%p196_p12, %s475_s30), 7  ;;  %217 = sbr.rel (%p479_p13) target bundleno = 34 (0x22), region = 32 }
  0x1c   : > { %s477_s4 = sshll.u32 %s195_s3, 4  ;;  %s476_s5 = sshll.u32 %s825_s30, 1  ;;  %v657_v0 = vmov (!%p479_p13), 0.0  }
  0x1d   : > { %s203_s6 = sadd.s32 %s477_s4, %s476_s5  ;;  %218 = vst [vmem:[#allocation2] sm:$0xff] (!%p479_p13), %v657_v0  ;;  %219 = vst [vmem:[#allocation2 + $0x8] sm:$0xff] (!%p479_p13), %v657_v0 }
  0x1e   : > { %s478_s7 = sshll.u32 %s203_s6, 3 }
  0x1f   : > { %s740_s19 = scalar_lea.vmem %s804_s0, %s478_s7 }
  0x22 PF: > { %v224_v1 = vld [vmem:[%s805_s1 + $0x20] sm:$0xff]  ;;  %v658_v2 = vmov 0   ;;  %v221_v3 = vld [vmem:[%s805_s1 + $0x8] sm:$0xff]  ;;  %v222_v5 = vld [vmem:[%s805_s1 + $0x10] sm:$0xff]  ;;  %s493_s4 = sadd.s32 (%p725_p8), 4294967295, %s639_s11  ;;  %s495_s5 = sshll.u32 (%p725_p8), %s643_s12, 1 }
  0x23   : > { %559 = vset.pattern.permute.xlu0 %v658_v2  ;;  %560 = vset.pattern.permute.xlu1 %v658_v2  ;;  %v220_v4 = vld [vmem:[%s805_s1] sm:$0xff]  ;;  %v223_v6 = vld [vmem:[%s805_s1 + $0x18] sm:$0xff]  ;;  %v480_v7 = vld [vmem:[%s740_s19 + $0x10] sm:$0xff]  ;;  %p352_p0 = scmp.gt.s32.totalorder (%p725_p8), %s493_s4, 0 }
  0x24   : > { %247 = vperm.xlu0 %559, %v224_v1   ;;  %232 = vperm.xlu1 %560, %v221_v3   ;;  %v481_v8 = vld [vmem:[%s740_s19 + $0x18] sm:$0xff]  ;;  %v297_v17 = vld [vmem:[%s740_s19] sm:$0xff]  ;;  %v298_v19 = vld [vmem:[%s740_s19 + $0x8] sm:$0xff] }
  0x25   : > { %v250_v34 = vld [vmem:[#allocation2] sm:$0xff]  ;;  %v251_v37 = vld [vmem:[#allocation2 + $0x8] sm:$0xff] }
  0x28   : > { %227 = vperm.xlu0 %559, %v220_v4   ;;  %237 = vperm.xlu1 %560, %v222_v5  }
  0x2c   : > { %242 = vperm.xlu0 %559, %v223_v6  }
  0xa3   : > { %v248_v9 = vpop.permute.xlu0 %247  ;;  %v233_v28 = vpop.permute.xlu1 %232 }
  0xa4   : > { %v255_v10 = vadd.f32 %v480_v7, %v248_v9  ;;  %v256_v11 = vadd.f32 %v481_v8, %v248_v9  ;;  %v299_v20 = vadd.f32 %v297_v17, %v248_v9  ;;  %v764_v21 = vadd.f32 %v298_v19, %v248_v9 }
  0xa6   : > { %v482_v12 = vmul.f32 -1.442695, %v255_v10  ;;  %v483_v13 = vmul.f32 -1.442695, %v256_v11  ;;  %v486_v22 = vmul.f32 -1.442695, %v299_v20 }
  0xa7   : > { %v487_v23 = vmul.f32 -1.442695, %v764_v21  ;;  %v228_v25 = vpop.permute.xlu0 %227  ;;  %v238_v35 = vpop.permute.xlu1 %237 }
  0xa8   : > { %561 = vpow2.f32 %v482_v12  ;;  %v269_v40 = vmul.f32 %v250_v34, %v238_v35  ;;  %v270_v42 = vmul.f32 %v251_v37, %v238_v35 }
  0xa9   : > { %563 = vpow2.f32 %v483_v13 }
  0xab   : > { %v243_v39 = vpop.permute.xlu0 %242 }
  0xac   : > { %v279_v44 = vmul.f32 %v255_v10, %v243_v39  ;;  %v280_v46 = vmul.f32 %v256_v11, %v243_v39  ;;  %v323_v4 = vmul.f32 %v299_v20, %v243_v39  ;;  %v324_v6 = vmul.f32 %v764_v21, %v243_v39 }
  0xb2   : > { %v562_v14 = vpop.eup %561 }
  0xb3   : > { %v564_v15 = vpop.eup %563  ;;  %v263_v16 = vadd.f32 1.0, %v562_v14 }
  0xb4   : > { %v264_v18 = vadd.f32 1.0, %v564_v15 }
  0xb5   : > { %565 = vrcp.f32 %v263_v16 }
  0xb6   : > { %567 = vrcp.f32 %v264_v18 }
  0xb7   : > { %569 = vpow2.f32 %v486_v22 }
  0xb8   : > { %571 = vpow2.f32 %v487_v23 }
  0xbf   : > { %v566_v24 = vpop.eup %565 }
  0xc0   : > { %v568_v26 = vpop.eup %567  ;;  %v271_v27 = vmul.f32 %v566_v24, %v228_v25 }
  0xc1   : > { %v272_v29 = vmul.f32 %v568_v26, %v228_v25  ;;  %v570_v32 = vpop.eup %569 }
  0xc2   : > { %v273_v30 = vadd.f32 %v271_v27, %v233_v28  ;;  %v572_v33 = vpop.eup %571  ;;  %v307_v36 = vadd.f32 1.0, %v570_v32 }
  0xc3   : > { %v274_v31 = vadd.f32 %v272_v29, %v233_v28  ;;  %v308_v38 = vadd.f32 1.0, %v572_v33 }
  0xc4   : > { %573 = vrcp.f32 %v273_v30 }
  0xc5   : > { %575 = vrcp.f32 %v274_v31 }
  0xc6   : > { %577 = vrcp.f32 %v307_v36 }
  0xc7   : > { %579 = vrcp.f32 %v308_v38 }
  0xce   : > { %v574_v41 = vpop.eup %573 }
  0xcf   : > { %v576_v43 = vpop.eup %575  ;;  %v276_v45 = vmul.f32 %v574_v41, %v269_v40 }
  0xd0   : > { %v278_v47 = vmul.f32 %v576_v43, %v270_v42  ;;  %v578_v52 = vpop.eup %577 }
  0xd1   : > { %v281_v48 = vadd.f32 %v279_v44, %v276_v45  ;;  %v580_v53 = vpop.eup %579  ;;  %v315_v54 = vmul.f32 %v578_v52, %v228_v25 }
  0xd2   : > { %v282_v49 = vadd.f32 %v280_v46, %v278_v47  ;;  %v316_v55 = vmul.f32 %v580_v53, %v228_v25 }
  0xd3   : > { %v484_v50 = vmul.f32 -1.442695, %v281_v48  ;;  %v317_v58 = vadd.f32 %v315_v54, %v233_v28 }
  0xd4   : > { %v485_v51 = vmul.f32 -1.442695, %v282_v49  ;;  %v318_v60 = vadd.f32 %v316_v55, %v233_v28 }
  0xd5   : > { %581 = vpow2.f32 %v484_v50 }
  0xd6   : > { %583 = vpow2.f32 %v485_v51 }
  0xdf   : > { %v582_v56 = vpop.eup %581 }
  0xe0   : > { %v584_v57 = vpop.eup %583  ;;  %v289_v59 = vadd.f32 1.0, %v582_v56 }
  0xe1   : > { %v290_v61 = vadd.f32 1.0, %v584_v57 }
  0xe2   : > { %585 = vrcp.f32 %v289_v59 }
  0xe3   : > { %587 = vrcp.f32 %v290_v61 }
  0xe4   : > { %589 = vrcp.f32 %v317_v58 }
  0xe5   : > { %591 = vrcp.f32 %v318_v60 }
  0xec   : > { %v586_v62 = vpop.eup %585 }
  0xed   : > { %v588_v63 = vpop.eup %587  ;;  %295 = vst [vmem:[%s742_s20] sm:$0xff] %v586_v62  ;;  %v313_v0 = vmul.f32 %v586_v62, %v238_v35 }
  0xee   : > { %v590_v1 = vpop.eup %589  ;;  %296 = vst [vmem:[%s742_s20 + $0x8] sm:$0xff] %v588_v63  ;;  %v314_v2 = vmul.f32 %v588_v63, %v238_v35 }
  0xef   : > { %v592_v3 = vpop.eup %591  ;;  %v320_v5 = vmul.f32 %v590_v1, %v313_v0 }
  0xf0   : > { %v322_v7 = vmul.f32 %v592_v3, %v314_v2 }
  0xf1   : > { %v325_v8 = vadd.f32 %v323_v4, %v320_v5 }
  0xf2   : > { %v326_v9 = vadd.f32 %v324_v6, %v322_v7 }
  0xf3   : > { %v488_v10 = vmul.f32 -1.442695, %v325_v8 }
  0xf4   : > { %v489_v11 = vmul.f32 -1.442695, %v326_v9  ;;  %v374_v18 = vld [vmem:[%s742_s20] sm:$0xff] (%p725_p8) }
  0xf5   : > { %593 = vpow2.f32 %v488_v10  ;;  %v376_v19 = vld [vmem:[%s742_s20 + $0x8] sm:$0xff] (%p725_p8) }
  0xf6   : > { %595 = vpow2.f32 %v489_v11 }
  0xff   : > { %v594_v12 = vpop.eup %593 }
 0x100   : > { %v596_v13 = vpop.eup %595  ;;  %v333_v14 = vadd.f32 1.0, %v594_v12 }
 0x101   : > { %v334_v15 = vadd.f32 1.0, %v596_v13 }
 0x102   : > { %597 = vrcp.f32 %v333_v14 }
 0x103   : > { %599 = vrcp.f32 %v334_v15 }
 0x108   : > { %350 = sbr.rel (!%p725_p8) target bundleno = 279 (0x117), region = 36 }
 0x10c   : > { %v598_v16 = vpop.eup %597 }
 0x10d   : > { %v600_v17 = vpop.eup %599  ;;  %490 = vst [vmem:[%s742_s20 + $0x10] sm:$0xff] %v598_v16  ;;  %342 = vst [vmem:[#allocation2] sm:$0xff] %v598_v16 }
 0x10e   : > { %491 = vst [vmem:[%s742_s20 + $0x18] sm:$0xff] %v600_v17  ;;  %343 = vst [vmem:[#allocation2 + $0x8] sm:$0xff] %v600_v17 }
 0x10f   : > { %s827_s4 = smov (!%p352_p0, %s493_s4), 0 }
 0x110   : > { %s500_s6 = sshll.u32 %s827_s4, 3 }
 0x111   : > { %s359_s7 = sadd.s32 %s500_s6, %s495_s5 }
 0x112   : > { %s497_s8 = sshll.u32 %s359_s7, 3 }
 0x113   : > { %s361_s19 = scalar_lea.vmem %s806_s2, %s497_s8 }
 0x114   : > { %v378_v20 = vld [vmem:[%s742_s20 + $0x10] sm:$0xff]  ;;  %375 = vst [vmem:[%s361_s19] sm:$0xff] %v374_v18  ;;  %377 = vst [vmem:[%s361_s19 + $0x8] sm:$0xff] %v376_v19 }
 0x115   : > { %v380_v21 = vld [vmem:[%s742_s20 + $0x18] sm:$0xff]  ;;  %379 = vst [vmem:[%s361_s19 + $0x20] sm:$0xff] %v378_v20 }
 0x116   : > { %381 = vst [vmem:[%s361_s19 + $0x28] sm:$0xff] %v380_v21 }
 0x117 PF: > { %s12_s15 = sadd.s32 1, %s655_s15   ;;  %s808_s9 = smov %s635_s10 }
 0x118   : > { %p9_p1 = scmp.ge.s32.totalorder %s12_s15, 10   ;;  %s809_s10 = smov %s731_s26 }
 0x119   : > { %s810_s11 = smov %s647_s13  ;;  %s811_s12 = smov %s651_s14 }
 0x11a   : > { %s812_s13 = smov %s815_s17  ;;  %s813_s14 = smov %s821_s18 }
 0x11b   :  { %11 = sbr.rel (!%p9_p1) target bundleno = 4 (0x4), region = 87 }

</bundles_post_ra>
